<compile_context>
chip_gen: v6e
topology: v6e:2x2x1
jax: 0.10.0
libtpu: 0.0.40
codegen_flags: <defaults>
</compile_context>

<pallas_src>
import jax
import jax.numpy as jnp
from jax import lax
from jax.experimental import pallas as pl
from jax.experimental.pallas import tpu as pltpu

EPS = 1e-5


def _round_up(x, m):
    return ((x + m - 1) // m) * m


def _vmem_capacity_bytes():
    try:
        info = pltpu.get_tpu_info()
        cap = getattr(info, "vmem_capacity_bytes", None)
        if cap:
            return int(cap)
    except Exception:
        pass
    return 64 << 20  # conservative default (v7x per-core VMEM)


def _make_kernel(has_residual, col_tiled):
    """Build the fused Add->LN->Linear kernel body for the requested variant."""

    def kernel(*refs):
        if has_residual:
            (x_ref, res_ref, gamma_ref, beta_ref, w_ref, bmix_ref,
             h_out_ref, res_out_ref) = refs
        else:
            (x_ref, gamma_ref, beta_ref, w_ref, bmix_ref, h_out_ref) = refs

        x = x_ref[...].astype(jnp.float32)              # native-dtype stream -> fp32 math
        if has_residual:
            new_res = x + res_ref[...]                  # residual streamed as fp32
        else:
            new_res = x

        if has_residual:
            if col_tiled:
                # Residual block index is constant across j; write it once (j == 0).
                @pl.when(pl.program_id(1) == 0)
                def _():
                    res_out_ref[...] = new_res
            else:
                res_out_ref[...] = new_res

        # Fused single-pass LayerNorm statistics in fp32.
        mean = jnp.mean(new_res, axis=-1, keepdims=True)
        mean_sq = jnp.mean(new_res * new_res, axis=-1, keepdims=True)
        var = mean_sq - mean * mean
        normed = (new_res - mean) * lax.rsqrt(var + EPS)
        normed = normed * gamma_ref[...] + beta_ref[...]

        # Mixer: bf16 x bf16 on the MXU with fp32 accumulation.
        h = jnp.dot(normed.astype(jnp.bfloat16), w_ref[...],
                    preferred_element_type=jnp.float32)
        h_out_ref[...] = (h + bmix_ref[...]).astype(h_out_ref.dtype)

    return kernel


def block_forward(hidden_states, residual, gamma, beta, w_mix, b_mix, *, tm=None, tn=None):
    """hidden_states: (B, L, D) in its native dtype (bf16 recommended).
    residual: (B, L, D) or None (first block). Returns (hidden_out, residual_out_fp32)."""
    B, L, D = hidden_states.shape
    rows = B * L
    has_residual = residual is not None
    out_dtype = hidden_states.dtype

    x2 = hidden_states.reshape(rows, D)                       # keep native dtype
    gamma2 = gamma.reshape(1, D).astype(jnp.float32)
    beta2 = beta.reshape(1, D).astype(jnp.float32)
    bmix2 = b_mix.reshape(1, D).astype(jnp.float32)
    w_bf16 = w_mix.astype(jnp.bfloat16)                       # resident at half footprint

    # ---- tile sizes -------------------------------------------------------
    if tm is None:
        tm = 1024 if D <= 512 else (512 if D <= 1024 else 256)
    tm = max(8, min(tm, _round_up(rows, 8)))

    vmem_cap = _vmem_capacity_bytes()
    budget = min(int(0.8 * vmem_cap), 100 << 20)

    x_bytes = jnp.dtype(x2.dtype).itemsize
    o_bytes = jnp.dtype(out_dtype).itemsize

    def est(tm_, tn_):
        # Double-buffered row streams.
        stream = 2 * tm_ * D * x_bytes + 2 * tm_ * tn_ * o_bytes
        if has_residual:
            stream += 2 * tm_ * D * 4 * 2                     # residual in + out (fp32)
        weight = 2 * D * tn_ * 2                              # bf16, assume double-buffered
        vecs = 2 * (3 * D + tn_) * 4
        live = 4 * tm_ * D * 4                                # fp32 intermediates in body
        return stream + weight + vecs + live

    if tn is None:
        tn = D                                                # full weight resident
        while est(tm, tn) > budget and tm > 256:
            tm //= 2
        if est(tm, tn) > budget and D % 256 == 0 and D > 256:
            # Column-tile the weight (v7x / very large D fallback).
            tn = 512 if D % 512 == 0 else 256
            while est(tm, tn) > budget and tm > 128:
                tm //= 2
    assert D % tn == 0 and tn % 128 == 0 or tn == D, "tn must divide D (multiple of 128)"
    col_tiled = tn < D

    vmem_limit = int(min(int(0.9 * vmem_cap), max(32 << 20, 2 * est(tm, tn))))

    # ---- grid / specs -----------------------------------------------------
    n_i = pl.cdiv(rows, tm)
    kernel = _make_kernel(has_residual, col_tiled)

    h_struct = jax.ShapeDtypeStruct((rows, D), out_dtype)
    res_struct = jax.ShapeDtypeStruct((rows, D), jnp.float32)   # residual_in_fp32 contract

    if not col_tiled:
        grid = (n_i,)
        x_spec = pl.BlockSpec((tm, D), lambda i: (i, 0))
        res_in_spec = pl.BlockSpec((tm, D), lambda i: (i, 0))
        gamma_spec = pl.BlockSpec((1, D), lambda i: (0, 0))      # grid-invariant -> resident
        beta_spec = pl.BlockSpec((1, D), lambda i: (0, 0))
        w_spec = pl.BlockSpec((D, D), lambda i: (0, 0))          # grid-invariant -> resident
        bmix_spec = pl.BlockSpec((1, D), lambda i: (0, 0))
        h_spec = pl.BlockSpec((tm, D), lambda i: (i, 0))
        res_out_spec = pl.BlockSpec((tm, D), lambda i: (i, 0))
        dims = ("parallel",)
    else:
        grid = (n_i, D // tn)
        x_spec = pl.BlockSpec((tm, D), lambda i, j: (i, 0))      # resident across j
        res_in_spec = pl.BlockSpec((tm, D), lambda i, j: (i, 0))
        gamma_spec = pl.BlockSpec((1, D), lambda i, j: (0, 0))
        beta_spec = pl.BlockSpec((1, D), lambda i, j: (0, 0))
        w_spec = pl.BlockSpec((D, tn), lambda i, j: (0, j))      # column tile of the weight
        bmix_spec = pl.BlockSpec((1, tn), lambda i, j: (0, j))
        h_spec = pl.BlockSpec((tm, tn), lambda i, j: (i, j))
        res_out_spec = pl.BlockSpec((tm, D), lambda i, j: (i, 0))
        dims = ("parallel", "arbitrary")

    if has_residual:
        r2 = residual.reshape(rows, D).astype(jnp.float32)       # no-op if already fp32
        in_specs = [x_spec, res_in_spec, gamma_spec, beta_spec, w_spec, bmix_spec]
        args = (x2, r2, gamma2, beta2, w_bf16, bmix2)
        out_shape = (h_struct, res_struct)
        out_specs = [h_spec, res_out_spec]
    else:
        in_specs = [x_spec, gamma_spec, beta_spec, w_spec, bmix_spec]
        args = (x2, gamma2, beta2, w_bf16, bmix2)
        out_shape = h_struct
        out_specs = h_spec

    result = pl.pallas_call(
        kernel,
        out_shape=out_shape,
        grid_spec=pltpu.PrefetchScalarGridSpec(
            num_scalar_prefetch=0,
            grid=grid,
            in_specs=in_specs,
            out_specs=out_specs,
        ),
        compiler_params=pltpu.CompilerParams(
            dimension_semantics=dims,
            vmem_limit_bytes=vmem_limit,
        ),
    )(*args)

    if has_residual:
        h2, res2 = result
        return h2.reshape(B, L, D), res2.reshape(B, L, D)
    # First block: residual_out is hidden_states itself (fp32 per residual_in_fp32);
    # no redundant HBM write from the kernel.
    h2 = result
    return h2.reshape(B, L, D), hidden_states.astype(jnp.float32)


def reference_forward(hidden_states, residual, gamma, beta, w_mix, b_mix):
    x = hidden_states.astype(jnp.float32)
    res = x if residual is None else x + residual.astype(jnp.float32)
    mean = jnp.mean(res, axis=-1, keepdims=True)
    mean_sq = jnp.mean(res * res, axis=-1, keepdims=True)
    var = mean_sq - mean * mean
    normed = (res - mean) * lax.rsqrt(var + EPS) * gamma + beta
    # Match the kernel's bf16 MXU operands with fp32 accumulation.
    h = jnp.einsum("bld,de->ble", normed.astype(jnp.bfloat16),
                   w_mix.astype(jnp.bfloat16),
                   preferred_element_type=jnp.float32) + b_mix
    return h.astype(hidden_states.dtype), res


def _check(name, got, want, atol, rtol):
    ok = jnp.allclose(got.astype(jnp.float32), want.astype(jnp.float32),
                      atol=atol, rtol=rtol)
    assert bool(ok), f"{name} mismatch"


if __name__ == "__main__":
    def make_inputs(B, L, D, key):
        k1, k2, k3, k4, k5, k6 = jax.random.split(key, 6)
        hidden = jax.random.normal(k1, (B, L, D), jnp.float32).astype(jnp.bfloat16)
        resid = jax.random.normal(k2, (B, L, D), jnp.float32)
        gamma = 1.0 + 0.1 * jax.random.normal(k3, (D,), jnp.float32)
        beta = 0.05 * jax.random.normal(k4, (D,), jnp.float32)
        w = 0.02 * jax.random.normal(k5, (D, D), jnp.float32)
        b = 0.01 * jax.random.normal(k6, (D,), jnp.float32)
        return hidden, resid, gamma, beta, w, b

    # 1) Residual path, rows divide the tile evenly (B=2, L=8, D=128).
    h, r, g, bt, w, bm = make_inputs(2, 8, 128, jax.random.PRNGKey(0))
    h_out, res_out = jax.block_until_ready(block_forward(h, r, g, bt, w, bm))
    h_ref, res_ref = reference_forward(h, r, g, bt, w, bm)
    _check("res-path h", h_out, h_ref, 2e-2, 2e-2)
    _check("res-path residual", res_out, res_ref, 1e-6, 1e-6)

    # 2) First block (residual=None): no residual_out stream from the kernel.
    h0_out, r0_out = jax.block_until_ready(block_forward(h, None, g, bt, w, bm))
    h0_ref, r0_ref = reference_forward(h, None, g, bt, w, bm)
    _check("first-block h", h0_out, h0_ref, 2e-2, 2e-2)
    _check("first-block residual", r0_out, r0_ref, 1e-6, 1e-6)

    # 3) Ragged rows (B*L not a multiple of the row tile): no wrapper pad/slice.
    h2, r2, g2, bt2, w2, bm2 = make_inputs(2, 7, 128, jax.random.PRNGKey(1))
    hr_out, rr_out = jax.block_until_ready(block_forward(h2, r2, g2, bt2, w2, bm2))
    hr_ref, rr_ref = reference_forward(h2, r2, g2, bt2, w2, bm2)
    _check("ragged h", hr_out, hr_ref, 2e-2, 2e-2)
    _check("ragged residual", rr_out, rr_ref, 1e-6, 1e-6)

    # 4) Column-tiled weight path (v7x / large-D fallback), forced at a small shape.
    h3, r3, g3, bt3, w3, bm3 = make_inputs(2, 8, 256, jax.random.PRNGKey(2))
    hc_out, rc_out = jax.block_until_ready(
        block_forward(h3, r3, g3, bt3, w3, bm3, tn=128))
    hc_ref, rc_ref = reference_forward(h3, r3, g3, bt3, w3, bm3)
    _check("col-tiled h", hc_out, hc_ref, 2e-2, 2e-2)
    _check("col-tiled residual", rc_out, rc_ref, 1e-6, 1e-6)

    print("KERNEL_OK")
</pallas_src>

<mosaic_0001>
module attributes {stable_mosaic.version = 11 : i64} {
  func.func @kernel(%arg0: i32, %arg1: memref<16x128xbf16, #tpu.memory_space<vmem>>, %arg2: memref<16x128xf32, #tpu.memory_space<vmem>>, %arg3: memref<1x128xf32, #tpu.memory_space<vmem>>, %arg4: memref<1x128xf32, #tpu.memory_space<vmem>>, %arg5: memref<128x128xbf16, #tpu.memory_space<vmem>>, %arg6: memref<1x128xf32, #tpu.memory_space<vmem>>, %arg7: memref<16x128xbf16, #tpu.memory_space<vmem>>, %arg8: memref<16x128xf32, #tpu.memory_space<vmem>>) attributes {dimension_semantics = [#tpu.dimension_semantics<parallel>], iteration_bounds = array<i64: 1>, scalar_prefetch = 0 : i64, scratch_operands = 0 : i64, tpu.core_type = #tpu.core_type<tc>, window_params = [{transform_indices = @transform_0, window_bounds = array<i64: 16, 128>}, {transform_indices = @transform_1, window_bounds = array<i64: 16, 128>}, {pipeline_mode = #tpu.pipeline_mode<synchronous>, transform_indices = @transform_2, window_bounds = array<i64: 1, 128>}, {pipeline_mode = #tpu.pipeline_mode<synchronous>, transform_indices = @transform_3, window_bounds = array<i64: 1, 128>}, {pipeline_mode = #tpu.pipeline_mode<synchronous>, transform_indices = @transform_4, window_bounds = array<i64: 128, 128>}, {pipeline_mode = #tpu.pipeline_mode<synchronous>, transform_indices = @transform_5, window_bounds = array<i64: 1, 128>}, {transform_indices = @transform_6, window_bounds = array<i64: 16, 128>}, {transform_indices = @transform_7, window_bounds = array<i64: 16, 128>}]} {
    %c0 = arith.constant 0 : index
    %c0_0 = arith.constant 0 : index
    %0 = vector.load %arg1[%c0, %c0_0] : memref<16x128xbf16, #tpu.memory_space<vmem>>, vector<16x128xbf16>
    %1 = arith.extf %0 : vector<16x128xbf16> to vector<16x128xf32>
    %c0_1 = arith.constant 0 : index
    %c0_2 = arith.constant 0 : index
    %2 = vector.load %arg2[%c0_1, %c0_2] : memref<16x128xf32, #tpu.memory_space<vmem>>, vector<16x128xf32>
    %3 = arith.addf %1, %2 : vector<16x128xf32>
    %c0_3 = arith.constant 0 : index
    %c0_4 = arith.constant 0 : index
    %4 = vector.load %arg8[%c0_3, %c0_4] : memref<16x128xf32, #tpu.memory_space<vmem>>, vector<16x128xf32>
    tpu.vector_store %arg8[%c0_3, %c0_4], %3 {strides = array<i32>} : memref<16x128xf32, #tpu.memory_space<vmem>>, vector<16x128xf32>,
    %cst = arith.constant dense<0.000000e+00> : vector<16xf32>
    %5 = vector.multi_reduction <add>, %3, %cst [1] : vector<16x128xf32> to vector<16xf32>
    %6 = vector.shape_cast %5 : vector<16xf32> to vector<16x1xf32>
    %cst_5 = arith.constant 1.280000e+02 : f32
    %7 = vector.broadcast %cst_5 : f32 to vector<16x1xf32>
    %8 = arith.divf %6, %7 : vector<16x1xf32>
    %9 = arith.mulf %3, %3 : vector<16x128xf32>
    %cst_6 = arith.constant dense<0.000000e+00> : vector<16xf32>
    %10 = vector.multi_reduction <add>, %9, %cst_6 [1] : vector<16x128xf32> to vector<16xf32>
    %11 = vector.shape_cast %10 : vector<16xf32> to vector<16x1xf32>
    %cst_7 = arith.constant 1.280000e+02 : f32
    %12 = vector.broadcast %cst_7 : f32 to vector<16x1xf32>
    %13 = arith.divf %11, %12 : vector<16x1xf32>
    %14 = arith.mulf %8, %8 : vector<16x1xf32>
    %15 = arith.subf %13, %14 : vector<16x1xf32>
    %16 = vector.broadcast %8 : vector<16x1xf32> to vector<16x128xf32>
    %17 = arith.subf %3, %16 : vector<16x128xf32>
    %cst_8 = arith.constant 9.99999974E-6 : f32
    %18 = vector.broadcast %cst_8 : f32 to vector<16x1xf32>
    %19 = arith.addf %15, %18 : vector<16x1xf32>
    %20 = math.rsqrt %19 : vector<16x1xf32>
    %21 = vector.broadcast %20 : vector<16x1xf32> to vector<16x128xf32>
    %22 = arith.mulf %17, %21 : vector<16x128xf32>
    %c0_9 = arith.constant 0 : index
    %c0_10 = arith.constant 0 : index
    %23 = vector.load %arg3[%c0_9, %c0_10] : memref<1x128xf32, #tpu.memory_space<vmem>>, vector<1x128xf32>
    %24 = vector.broadcast %23 : vector<1x128xf32> to vector<16x128xf32>
    %25 = arith.mulf %22, %24 : vector<16x128xf32>
    %c0_11 = arith.constant 0 : index
    %c0_12 = arith.constant 0 : index
    %26 = vector.load %arg4[%c0_11, %c0_12] : memref<1x128xf32, #tpu.memory_space<vmem>>, vector<1x128xf32>
    %27 = vector.broadcast %26 : vector<1x128xf32> to vector<16x128xf32>
    %28 = arith.addf %25, %27 : vector<16x128xf32>
    %29 = arith.truncf %28 : vector<16x128xf32> to vector<16x128xbf16>
    %c0_13 = arith.constant 0 : index
    %c0_14 = arith.constant 0 : index
    %30 = vector.load %arg5[%c0_13, %c0_14] : memref<128x128xbf16, #tpu.memory_space<vmem>>, vector<128x128xbf16>
    %cst_15 = arith.constant dense<0.000000e+00> : vector<16x128xf32>
    %31 = tpu.matmul %29, %30, %cst_15 {dimension_numbers = #tpu.dot_dimension_numbers<[1], [0], [0], [1], [0, 0, 1, 1], [], []>} : vector<16x128xbf16>, vector<128x128xbf16>, vector<16x128xf32> -> vector<16x128xf32>
    %c0_16 = arith.constant 0 : index
    %c0_17 = arith.constant 0 : index
    %32 = vector.load %arg6[%c0_16, %c0_17] : memref<1x128xf32, #tpu.memory_space<vmem>>, vector<1x128xf32>
    %33 = vector.broadcast %32 : vector<1x128xf32> to vector<16x128xf32>
    %34 = arith.addf %31, %33 : vector<16x128xf32>
    %35 = arith.truncf %34 : vector<16x128xf32> to vector<16x128xbf16>
    %c0_18 = arith.constant 0 : index
    %c0_19 = arith.constant 0 : index
    %36 = vector.load %arg7[%c0_18, %c0_19] : memref<16x128xbf16, #tpu.memory_space<vmem>>, vector<16x128xbf16>
    tpu.vector_store %arg7[%c0_18, %c0_19], %35 {strides = array<i32>} : memref<16x128xbf16, #tpu.memory_space<vmem>>, vector<16x128xbf16>,
    return
  }
  func.func @transform_0(%arg0: i32) -> (i32, i32) {
    %c0_i32 = arith.constant 0 : i32
    %c0_i32_0 = arith.constant 0 : i32
    return %arg0, %c0_i32 : i32, i32
  }
  func.func @transform_1(%arg0: i32) -> (i32, i32) {
    %c0_i32 = arith.constant 0 : i32
    %c0_i32_0 = arith.constant 0 : i32
    return %arg0, %c0_i32 : i32, i32
  }
  func.func @transform_2(%arg0: i32) -> (i32, i32) {
    %c0_i32 = arith.constant 0 : i32
    %c0_i32_0 = arith.constant 0 : i32
    %c0_i32_1 = arith.constant 0 : i32
    return %c0_i32, %c0_i32_0 : i32, i32
  }
  func.func @transform_3(%arg0: i32) -> (i32, i32) {
    %c0_i32 = arith.constant 0 : i32
    %c0_i32_0 = arith.constant 0 : i32
    %c0_i32_1 = arith.constant 0 : i32
    return %c0_i32, %c0_i32_0 : i32, i32
  }
  func.func @transform_4(%arg0: i32) -> (i32, i32) {
    %c0_i32 = arith.constant 0 : i32
    %c0_i32_0 = arith.constant 0 : i32
    %c0_i32_1 = arith.constant 0 : i32
    return %c0_i32, %c0_i32_0 : i32, i32
  }
  func.func @transform_5(%arg0: i32) -> (i32, i32) {
    %c0_i32 = arith.constant 0 : i32
    %c0_i32_0 = arith.constant 0 : i32
    %c0_i32_1 = arith.constant 0 : i32
    return %c0_i32, %c0_i32_0 : i32, i32
  }
  func.func @transform_6(%arg0: i32) -> (i32, i32) {
    %c0_i32 = arith.constant 0 : i32
    %c0_i32_0 = arith.constant 0 : i32
    return %arg0, %c0_i32 : i32, i32
  }
  func.func @transform_7(%arg0: i32) -> (i32, i32) {
    %c0_i32 = arith.constant 0 : i32
    %c0_i32_0 = arith.constant 0 : i32
    return %arg0, %c0_i32 : i32, i32
  }
}

</mosaic_0001>

<bundles_post_ra>
// kernel: tpu_custom_call.1
= control target key start
LH: loop header
LB: loop body
LE: loop exit
PB: predicated region body
PF: predicated region fallthrough
CT: control target
= control target key end

     0   :  { %13 = vsyncpa [#allocation3], 0  ;;  %s555_s0 = inlined_call_operand.hbm [shape: bf16[16,128], index: 0, kind: input, shape index: {}]   ;;  %s556_s1 = inlined_call_operand.hbm [shape: f32[16,128], index: 1, kind: input, shape index: {}]   ;;  %s557_s2 = inlined_call_operand.vmem [shape: f32[1,128], index: 2, kind: input, shape index: {}]   ;;  %s558_s3 = inlined_call_operand.vmem [shape: f32[1,128], index: 3, kind: input, shape index: {}]   ;;  %s559_s4 = inlined_call_operand.hbm [shape: bf16[128,128], index: 4, kind: input, shape index: {}]   ;;  %s560_s5 = inlined_call_operand.vmem [shape: f32[1,128], index: 5, kind: input, shape index: {}]   ;;  %s561_s6 = inlined_call_operand.hbm [shape: bf16[16,128], index: 6, kind: output, shape index: {0}]   ;;  %s562_s7 = inlined_call_operand.hbm [shape: f32[16,128], index: 7, kind: output, shape index: {1}]  }
   0x1   :  { %14 = vsyncpa [#allocation6], 0 }
   0x2   :  { %15 = vsyncpa [#allocation4], 0 }
   0x3   :  { %16 = vsyncpa [#allocation10], 0  ;;  %s465_s24 = smov [#allocation5]  }
   0x4   :  { %s34_s25 = sshll.u32 %s465_s24, 4  ;;  %s35_s25 = int_to_ptr.vmem [resolvable:$true] %s34_s25 }
   0x5   :  { %s365_s26 = scalar_lea.vmem %s35_s25, 256  ;;  %p370_p1 = scmp.lt.s32.totalorder %s35_s25, %s35_s25 }
   0x6   :  { %p366_p0 = scmp.ne.s32.totalorder %s35_s25, %s365_s26  ;;  %p371_p2 = scmp.lt.s32.totalorder %s365_s26, %s365_s26 }
   0x8   :  { %p372_p3 = por %p371_p2, %p370_p1 }
   0xa   :  { %p373_p4 = pnand %p372_p3, %p366_p0 }
   0xc   :  { %376 = shalt.err (!%p373_p4)
}
   0xd   :  { %s466_s27 = smov 128   ;;  %s467_s28 = smov 8  }
   0xe   :  { %40 = dma.hbm_to_vmem [thread:$0]  %s556_s1, 256, %s35_s25, [#allocation6], %s466_s27, %s466_s27, %s467_s28  }
   0xf   :  { %s468_s8 = smov [#allocation2]  }
  0x10   :  { %s22_s9 = sshll.u32 %s468_s8, 4  ;;  %s23_s9 = int_to_ptr.vmem [resolvable:$true] %s22_s9 }
  0x11   :  { %s385_s10 = scalar_lea.vmem %s23_s9, 128  ;;  %p390_p6 = scmp.lt.s32.totalorder %s23_s9, %s23_s9 }
  0x12   :  { %p386_p5 = scmp.ne.s32.totalorder %s23_s9, %s385_s10  ;;  %p391_p7 = scmp.lt.s32.totalorder %s385_s10, %s385_s10 }
  0x14   :  { %p392_p8 = por %p391_p7, %p390_p6 }
  0x16   :  { %p393_p9 = pnand %p392_p8, %p386_p5 }
  0x18   :  { %396 = shalt.err (!%p393_p9)
}
  0x19   :  { %s469_s11 = smov 64   ;;  %s470_s12 = smov 4  }
  0x1a   :  { %28 = dma.hbm_to_vmem [thread:$0]  %s555_s0, 128, %s23_s9, [#allocation3], %s469_s11, %s469_s11, %s470_s12  }
  0x1b   :  { %s471_s1 = smov [#allocation7]  }
  0x1c   :  { %s50_s15 = sshll.u32 %s471_s1, 4  ;;  %s51_s15 = int_to_ptr.vmem [resolvable:$true] %s50_s15 }
  0x1d   :  { %s405_s16 = scalar_lea.vmem %s51_s15, 1024  ;;  %p410_p11 = scmp.lt.s32.totalorder %s51_s15, %s51_s15 }
  0x1e   :  { %p406_p10 = scmp.ne.s32.totalorder %s51_s15, %s405_s16  ;;  %p411_p12 = scmp.lt.s32.totalorder %s405_s16, %s405_s16 }
  0x20   :  { %p412_p13 = por %p411_p12, %p410_p11 }
  0x22   :  { %p413_p0 = pnand %p412_p13, %p406_p10 }
  0x24   :  { %416 = shalt.err (!%p413_p0)
}
  0x25   :  { %56 = dma.hbm_to_vmem [thread:$0]  %s559_s4, 1024, %s51_s15, [#allocation6], %s469_s11, %s469_s11, %s470_s12  }
  0x26   :  { %457 = dma.done.wait [#allocation3], 128  }
  0x27   :  { %458 = vsyncadd [#allocation3], 4294967168 }
  0x28   :  { %459 = dma.done.wait [#allocation6], 1280  }
  0x29   :  { %460 = vsyncadd [#allocation6], 4294966016  ;;  %v297_v0 = vld [vmem:[#allocation2] sm:$0xff]   ;;  %v73_v1 = vld [vmem:[#allocation5] sm:$0xff]  ;;  %v472_v10 = vmov 0.0   ;;  %vm473_vm0 = vmmov 0  }
  0x2a   :  { %v74_v2 = vld [vmem:[#allocation5 + $0x8] sm:$0xff]  ;;  %v298_v3 = vunpack.c.l.bf16 %v297_v0  ;;  %v299_v4 = vunpack.c.h.bf16 %v297_v0  ;;  %314 = vmatprep.subr.bf16.mxu0 %v472_v10  ;;  %v346_v11 = vld [vmem:[#allocation7 + $0x30] sm:$0xff]   ;;  %v347_v12 = vld [vmem:[#allocation7 + $0x28] sm:$0xff]   ;;  %330 = vmatprep.mubr.msk.bf16.mxu0 %vm473_vm0, %v472_v10  ;;  %s474_s21 = smov [#allocation9]  }
  0x2b   :  { %v345_v9 = vld [vmem:[#allocation7 + $0x38] sm:$0xff]   ;;  %v348_v13 = vld [vmem:[#allocation7 + $0x20] sm:$0xff]   ;;  %v350_v15 = vld [vmem:[#allocation7 + $0x10] sm:$0xff]   ;;  %s264_s22 = sshll.u32 %s474_s21, 4  ;;  %s265_s22 = int_to_ptr.vmem [resolvable:$true] %s264_s22 }
  0x2c   :  { %v75_v5 = vadd.f32 %v298_v3, %v73_v1  ;;  %v76_v6 = vadd.f32 %v299_v4, %v74_v2  ;;  %315 = vmatpush3.bf16.msra.mxu0 %v345_v9  ;;  %v349_v14 = vld [vmem:[#allocation7 + $0x18] sm:$0xff]   ;;  %v351_v16 = vld [vmem:[#allocation7 + $0x8] sm:$0xff]   ;;  %v352_v17 = vld [vmem:[#allocation7] sm:$0xff]   ;;  %s417_s23 = scalar_lea.vmem %s265_s22, 256  ;;  %p422_p2 = scmp.lt.s32.totalorder %s265_s22, %s265_s22 }
  0x2d   :  { %316 = vmatprep.subr.bf16.mxu0 %v472_v10  ;;  %v281_v35 = vld [vmem:[%s557_s2] ss:$0 sm:$0xff]  ;;  %p418_p1 = scmp.ne.s32.totalorder %s265_s22, %s417_s23  ;;  %p423_p3 = scmp.lt.s32.totalorder %s417_s23, %s417_s23 }
  0x2e   :  { %79 = vadd.xlane.f32.xlu0 %v75_v5  ;;  %77 = vst [vmem:[#allocation9] sm:$0xff] %v75_v5  ;;  %v86_v7 = vmul.f32 %v75_v5, %v75_v5  ;;  %78 = vst [vmem:[#allocation9 + $0x8] sm:$0xff] %v76_v6  ;;  %v87_v8 = vmul.f32 %v76_v6, %v76_v6  ;;  %v282_v40 = vld [vmem:[%s558_s3] ss:$0 sm:$0xff] }
  0x2f   :  { %p424_p4 = por %p423_p3, %p422_p2 }
  0x30   :  { %88 = vadd.xlane.f32.xlu1 %v86_v7  ;;  %317 = vmatpush3.bf16.msra.mxu0 %v346_v11 }
  0x31   :  { %318 = vmatprep.subr.bf16.mxu0 %v472_v10  ;;  %p425_p5 = pnand %p424_p4, %p418_p1 }
  0x32   :  { %81 = vadd.xlane.f32.xlu0 %v76_v6 }
  0x34   :  { %90 = vadd.xlane.f32.xlu1 %v87_v8  ;;  %319 = vmatpush3.bf16.msra.mxu0 %v347_v12 }
  0x35   :  { %320 = vmatprep.subr.bf16.mxu0 %v472_v10 }
  0x38   :  { %321 = vmatpush3.bf16.msra.mxu0 %v348_v13 }
  0x39   :  { %322 = vmatprep.subr.bf16.mxu0 %v472_v10 }
  0x3c   :  { %323 = vmatpush3.bf16.msra.mxu0 %v349_v14 }
  0x3d   :  { %324 = vmatprep.subr.bf16.mxu0 %v472_v10 }
  0x40   :  { %325 = vmatpush3.bf16.msra.mxu0 %v350_v15 }
  0x41   :  { %326 = vmatprep.subr.bf16.mxu0 %v472_v10 }
  0x44   :  { %327 = vmatpush3.bf16.msra.mxu0 %v351_v16 }
  0x45   :  { %328 = vmatprep.subr.bf16.mxu0 %v472_v10 }
  0x48   :  { %329 = vmatpush3.bf16.msra.mxu0 %v352_v17 }
  0xb7   :  { %v80_v18 = vpop.xlane.xlu0 %79 }
  0xb8   :  { %v84_v19 = vmul.f32 0.0078125, %v80_v18 }
  0xb9   :  { %v89_v20 = vpop.xlane.xlu1 %88 }
  0xba   :  { %v94_v21 = vmul.f32 %v84_v19, %v84_v19  ;;  %v92_v22 = vmul.f32 0.0078125, %v89_v20  ;;  %v98_v32 = vsub.f32 %v75_v5, %v84_v19 }
  0xbb   :  { %v82_v23 = vpop.xlane.xlu0 %81 }
  0xbc   :  { %v96_v24 = vsub.f32 %v92_v22, %v94_v21  ;;  %v85_v25 = vmul.f32 0.0078125, %v82_v23 }
  0xbd   :  { %v91_v26 = vpop.xlane.xlu1 %90 }
  0xbe   :  { %v100_v27 = vadd.f32 1e-05, %v96_v24  ;;  %v95_v28 = vmul.f32 %v85_v25, %v85_v25  ;;  %v93_v29 = vmul.f32 0.0078125, %v91_v26  ;;  %v99_v36 = vsub.f32 %v76_v6, %v85_v25 }
  0xc0   :  { %353 = vrsqrt.f32 %v100_v27  ;;  %v97_v30 = vsub.f32 %v93_v29, %v95_v28 }
  0xc2   :  { %v101_v31 = vadd.f32 1e-05, %v97_v30 }
  0xc4   :  { %355 = vrsqrt.f32 %v101_v31 }
  0xcd   :  { %v354_v33 = vpop.eup %353 }
  0xce   :  { %v104_v34 = vmul.f32 %v354_v33, %v98_v32 }
  0xd0   :  { %v113_v39 = vmul.f32 %v281_v35, %v104_v34 }
  0xd1   :  { %v356_v37 = vpop.eup %355 }
  0xd2   :  { %v105_v38 = vmul.f32 %v356_v37, %v99_v36  ;;  %v122_v42 = vadd.f32 %v282_v40, %v113_v39 }
  0xd4   :  { %v114_v41 = vmul.f32 %v281_v35, %v105_v38 }
  0xd6   :  { %v123_v43 = vadd.f32 %v282_v40, %v114_v41 }
  0xd8   :  { %v124_v44 = vpack.c.bf16 %v123_v43, %v122_v42 }
  0xda   :  { %331 = vmatmul.mubr.bf16.vlgmr.msra.gmra.mxu0 %v124_v44 }
  0xdb   :  { %428 = shalt.err (!%p425_p5)
}
  0xdc   :  { %270 = dma.vmem_to_hbm [thread:$0]  %s265_s22, 256, %s562_s7, [#allocation10], %s466_s27, %s466_s27, %s467_s28  }
  0xdd   :  { %v283_v46 = vld [vmem:[%s560_s5] ss:$0 sm:$0xff]  ;;  %s475_s26 = smov [#allocation8]  }
  0xde   :  { %s252_s29 = sshll.u32 %s475_s26, 4  ;;  %s253_s29 = int_to_ptr.vmem [resolvable:$true] %s252_s29 }
  0xdf   :  { %s437_s30 = scalar_lea.vmem %s253_s29, 128  ;;  %p442_p7 = scmp.lt.s32.totalorder %s253_s29, %s253_s29 }
  0xe0   :  { %p438_p6 = scmp.ne.s32.totalorder %s253_s29, %s437_s30  ;;  %p443_p8 = scmp.lt.s32.totalorder %s437_s30, %s437_s30 }
  0xe2   :  { %p444_p9 = por %p443_p8, %p442_p7 }
  0xe4   :  { %p445_p10 = pnand %p444_p9, %p438_p6 }
 0x19a   :  { %v230_v45 = vpop.f32.mrf.mxu0 }
 0x19b   :  { %v231_v49 = vadd.f32 %v283_v46, %v230_v45 }
 0x19c   :  { %v332_v47 = vpop.f32.mrf.mxu0 }
 0x19e   :  { %v233_v48 = vpop.f32.mrf.mxu0 }
 0x19f   :  { %v234_v50 = vadd.f32 %v283_v46, %v233_v48 }
 0x1a0   :  { %v333_v51 = vpop.f32.mrf.mxu0 }
 0x1a1   :  { %v303_v52 = vpack.c.bf16 %v234_v50, %v231_v49 }
 0x1a3   :  { %304 = vst [vmem:[#allocation8] sm:$0xff] %v303_v52  }
 0x1a4   :  { %448 = shalt.err (!%p445_p10)
}
 0x1a5   :  { %258 = dma.vmem_to_hbm [thread:$0]  %s253_s29, 128, %s561_s6, [#allocation4], %s469_s11, %s469_s11, %s470_s12  }
 0x1a6   :  { %461 = dma.done.wait [#allocation4], 128  }
 0x1a7   :  { %462 = vsyncadd [#allocation4], 4294967168 }
 0x1a8   :  { %463 = dma.done.wait [#allocation10], 256  }
 0x1a9   :  { %464 = vsyncadd [#allocation10], 4294967040 }
 0x1aa   :  { %277 = vsyncpa [#allocation3], 1 }
 0x1ab   :  { %278 = vsyncpa [#allocation6], 1 }
 0x1ac   :  { %279 = vsyncpa [#allocation4], 1 }
 0x1ad   :  { %280 = vsyncpa [#allocation10], 1 }

</bundles_post_ra>
